<compile_context>
chip_gen: v6e
topology: v6e:2x2x1
jax: 0.10.0
libtpu: 0.0.40
codegen_flags: <defaults>
</compile_context>

<pallas_src>
import jax
import jax.numpy as jnp
from jax import lax
from jax.experimental import pallas as pl
from jax.experimental.pallas import tpu as pltpu

# ---- hyperparameters -------------------------------------------------------
NUM_GAUSSIANS = 16
HIDDEN = 32
TAG_HIDDEN = 8
PG_HIDDEN = 4
PHYS_HIDDEN = 0               # phys_embeds=False -> n_properties == 0
NUM_ELEMENTS = 85
NUM_TAGS = 3
PERIOD_SIZE = 7
GROUP_SIZE = 18
ATOM_EMB_DIM = HIDDEN - TAG_HIDDEN - PHYS_HIDDEN - 2 * PG_HIDDEN   # = 16

# fused-vocabulary offsets (z | tag | period | group) and padded size
TAG_OFF = NUM_ELEMENTS                                   # 85
PER_OFF = TAG_OFF + NUM_TAGS                             # 88
GRP_OFF = PER_OFF + PERIOD_SIZE                          # 95
FUSED_ROWS = GRP_OFF + GROUP_SIZE                        # 113
FUSED_VOCAB = 128                                        # zero-padded to lane width

EDGE_IN = NUM_GAUSSIANS + 3                              # 19

# Row-tile size: mem-bound kernel, tiles this size stay far under the 32 MiB
# scoped VMEM default on every chip (incl. v7x's 64 MiB physical VMEM) while
# amortizing the ~0.35 us per-grid-step overhead.
MAX_ROW_TILE = 1024


# ---- kernels ---------------------------------------------------------------
def node_kernel(idx_ref, w_ref, b_ref, h_ref):
    """idx_ref: (TILE, 4) int32 fused-vocab indices (offsets pre-added).
       w_ref:   (128, 32) fused blockdiag(tables) @ lin_w.
       h_ref:   (TILE, 32) output = multi_hot @ w + lin_b."""
    tile_n = idx_ref.shape[0]
    idx = idx_ref[...]                                            # (TILE, 4)
    lanes = lax.broadcasted_iota(jnp.int32, (tile_n, FUSED_VOCAB), 1)
    mh = (lanes == idx[:, 0:1])
    mh = mh | (lanes == idx[:, 1:2])
    mh = mh | (lanes == idx[:, 2:3])
    mh = mh | (lanes == idx[:, 3:4])
    h_ref[...] = (jnp.dot(mh.astype(jnp.float32), w_ref[...],
                          preferred_element_type=jnp.float32)
                  + b_ref[...])


def edge_kernel(x_ref, w_ref, b_ref, e_ref):
    """x_ref: (TILE, 19) pre-concatenated cat(rel_pos, edge_attr)."""
    e_ref[...] = (jnp.dot(x_ref[...], w_ref[...],
                          preferred_element_type=jnp.float32)
                  + b_ref[...])


# ---- wrapper ---------------------------------------------------------------
def _round_up(x, m):
    return ((x + m - 1) // m) * m


def _tile_and_pad(n):
    """Pick a row tile (multiple of 8) and the padded row count it divides."""
    n8 = max(_round_up(n, 8), 8)
    tile = min(MAX_ROW_TILE, n8)
    return tile, _round_up(n8, tile)


def _fuse_node_weights(params):
    """blockdiag(emb, tag, period, group) @ lin_w, zero-padded to (128, 32)."""
    w_big = jnp.zeros((FUSED_VOCAB, HIDDEN), jnp.float32)
    w_big = w_big.at[0:TAG_OFF, 0:ATOM_EMB_DIM].set(params["emb_w"])
    w_big = w_big.at[TAG_OFF:PER_OFF,
                     ATOM_EMB_DIM:ATOM_EMB_DIM + TAG_HIDDEN].set(params["tag_w"])
    w_big = w_big.at[PER_OFF:GRP_OFF,
                     ATOM_EMB_DIM + TAG_HIDDEN:
                     ATOM_EMB_DIM + TAG_HIDDEN + PG_HIDDEN].set(params["per_w"])
    w_big = w_big.at[GRP_OFF:FUSED_ROWS,
                     ATOM_EMB_DIM + TAG_HIDDEN + PG_HIDDEN:HIDDEN].set(params["grp_w"])
    return jnp.dot(w_big, params["lin_w"],
                   preferred_element_type=jnp.float32)             # (128, 32)


def embedding_block_forward(params, z, rel_pos, edge_attr, tag):
    n = z.shape[0]
    num_edges = rel_pos.shape[0]

    # glue (same role as self.phys_emb.period[z] / .group[z] in torch)
    per_idx = params["period_table"][z]
    grp_idx = params["group_table"][z]

    # pack indices (fused-vocab offsets pre-added) -> one (N, 4) int32 stream.
    # NOTE: like the one-hot trick, out-of-range indices silently produce a
    # zero embedding instead of erroring like torch.nn.Embedding.
    idx = jnp.stack([z.astype(jnp.int32),
                     tag.astype(jnp.int32) + TAG_OFF,
                     per_idx.astype(jnp.int32) + PER_OFF,
                     grp_idx.astype(jnp.int32) + GRP_OFF], axis=1)   # (N, 4)

    # pre-concatenate edge features once (order matches torch.cat((rel_pos, edge_attr))).
    x_e = jnp.concatenate([rel_pos.astype(jnp.float32),
                           edge_attr.astype(jnp.float32)], axis=1)   # (E, 19)

    w_eff = _fuse_node_weights(params)                               # (128, 32)

    # ---- node pass ----------------------------------------------------------
    tile_n, n_pad = _tile_and_pad(n)
    if n_pad != n:
        idx = jnp.pad(idx, ((0, n_pad - n), (0, 0)))
    h_full = pl.pallas_call(
        node_kernel,
        out_shape=jax.ShapeDtypeStruct((n_pad, HIDDEN), jnp.float32),
        grid=(n_pad // tile_n,),
        in_specs=[
            pl.BlockSpec((tile_n, 4), lambda i: (i, 0)),
            pl.BlockSpec((FUSED_VOCAB, HIDDEN), lambda i: (0, 0)),   # VMEM-resident
            pl.BlockSpec((1, HIDDEN), lambda i: (0, 0)),             # VMEM-resident
        ],
        out_specs=pl.BlockSpec((tile_n, HIDDEN), lambda i: (i, 0)),
        compiler_params=pltpu.CompilerParams(
            dimension_semantics=("parallel",)),
    )(idx, w_eff, params["lin_b"])
    h = h_full[:n]

    # ---- edge pass ----------------------------------------------------------
    tile_e, e_pad = _tile_and_pad(num_edges)
    if e_pad != num_edges:
        x_e = jnp.pad(x_e, ((0, e_pad - num_edges), (0, 0)))
    e_full = pl.pallas_call(
        edge_kernel,
        out_shape=jax.ShapeDtypeStruct((e_pad, HIDDEN), jnp.float32),
        grid=(e_pad // tile_e,),
        in_specs=[
            pl.BlockSpec((tile_e, EDGE_IN), lambda i: (i, 0)),
            pl.BlockSpec((EDGE_IN, HIDDEN), lambda i: (0, 0)),       # VMEM-resident
            pl.BlockSpec((1, HIDDEN), lambda i: (0, 0)),             # VMEM-resident
        ],
        out_specs=pl.BlockSpec((tile_e, HIDDEN), lambda i: (i, 0)),
        compiler_params=pltpu.CompilerParams(
            dimension_semantics=("parallel",)),
    )(x_e, params["lin_e_w"], params["lin_e_b"])
    e = e_full[:num_edges]

    return h, e


# ---- deterministic parameter init ------------------------------------------
def init_params(key):
    ks = jax.random.split(key, 6)

    def xavier_uniform(k, shape):
        fan_in, fan_out = shape
        bound = (6.0 / (fan_in + fan_out)) ** 0.5
        return jax.random.uniform(k, shape, jnp.float32, -bound, bound)

    return {
        # Embedding tables (torch Embedding.reset_parameters -> N(0, 1))
        "emb_w": jax.random.normal(ks[0], (NUM_ELEMENTS, ATOM_EMB_DIM), jnp.float32),
        "tag_w": jax.random.normal(ks[1], (NUM_TAGS, TAG_HIDDEN), jnp.float32),
        "per_w": jax.random.normal(ks[2], (PERIOD_SIZE, PG_HIDDEN), jnp.float32),
        "grp_w": jax.random.normal(ks[3], (GROUP_SIZE, PG_HIDDEN), jnp.float32),
        # Linear layers (xavier_uniform weights, zero bias per reset_parameters),
        # stored [in, out] so y = x @ W + b (== torch Linear with W = weight.T)
        "lin_w": xavier_uniform(ks[4], (HIDDEN, HIDDEN)),
        "lin_b": jnp.zeros((1, HIDDEN), jnp.float32),
        "lin_e_w": xavier_uniform(ks[5], (EDGE_IN, HIDDEN)),
        "lin_e_b": jnp.zeros((1, HIDDEN), jnp.float32),
        # Synthetic, deterministic period/group lookup tables (stand-in for
        # the mendeleev-derived tables in PhysEmbedding)
        "period_table": jnp.arange(NUM_ELEMENTS, dtype=jnp.int32) % PERIOD_SIZE,
        "group_table": jnp.arange(NUM_ELEMENTS, dtype=jnp.int32) % GROUP_SIZE,
    }


if __name__ == "__main__":
    key = jax.random.PRNGKey(0)
    pkey, zkey, tkey, rkey, akey = jax.random.split(key, 5)
    params = init_params(pkey)

    N_ATOMS, N_EDGES = 8, 16
    z = jax.random.randint(zkey, (N_ATOMS,), 0, NUM_ELEMENTS, dtype=jnp.int32)
    tag = jax.random.randint(tkey, (N_ATOMS,), 0, NUM_TAGS, dtype=jnp.int32)
    rel_pos = jax.random.normal(rkey, (N_EDGES, 3), jnp.float32)
    edge_attr = jax.random.normal(akey, (N_EDGES, NUM_GAUSSIANS), jnp.float32)

    h, e = jax.jit(embedding_block_forward)(params, z, rel_pos, edge_attr, tag)
    jax.block_until_ready((h, e))

    assert h.shape == (N_ATOMS, HIDDEN) and h.dtype == jnp.float32
    assert e.shape == (N_EDGES, HIDDEN) and e.dtype == jnp.float32

    # pure-JAX reference (un-fused) for numerical check
    per_idx = params["period_table"][z]
    grp_idx = params["group_table"][z]
    h_cat = jnp.concatenate([params["emb_w"][z], params["tag_w"][tag],
                             params["per_w"][per_idx], params["grp_w"][grp_idx]],
                            axis=1)
    h_ref = h_cat @ params["lin_w"] + params["lin_b"]
    e_ref = (jnp.concatenate([rel_pos, edge_attr], axis=1) @ params["lin_e_w"]
             + params["lin_e_b"])
    assert jnp.allclose(h, h_ref, atol=1e-4, rtol=1e-4)
    assert jnp.allclose(e, e_ref, atol=1e-4, rtol=1e-4)

    print("KERNEL_OK")
</pallas_src>

<mosaic_0001>
module attributes {stable_mosaic.version = 11 : i64} {
  func.func @node_kernel(%arg0: i32, %arg1: memref<8x4xi32, #tpu.memory_space<vmem>>, %arg2: memref<128x32xf32, #tpu.memory_space<vmem>>, %arg3: memref<1x32xf32, #tpu.memory_space<vmem>>, %arg4: memref<8x32xf32, #tpu.memory_space<vmem>>) attributes {dimension_semantics = [#tpu.dimension_semantics<parallel>], iteration_bounds = array<i64: 1>, scalar_prefetch = 0 : i64, scratch_operands = 0 : i64, tpu.core_type = #tpu.core_type<tc>, window_params = [{transform_indices = @transform_0, window_bounds = array<i64: 8, 4>}, {pipeline_mode = #tpu.pipeline_mode<synchronous>, transform_indices = @transform_1, window_bounds = array<i64: 128, 32>}, {pipeline_mode = #tpu.pipeline_mode<synchronous>, transform_indices = @transform_2, window_bounds = array<i64: 1, 32>}, {transform_indices = @transform_3, window_bounds = array<i64: 8, 32>}]} {
    %c0 = arith.constant 0 : index
    %c0_0 = arith.constant 0 : index
    %0 = vector.load %arg1[%c0, %c0_0] : memref<8x4xi32, #tpu.memory_space<vmem>>, vector<8x4xi32>
    %1 = tpu.iota {dimensions = array<i32: 1>} : vector<8x128xi32>
    %2 = vector.extract_strided_slice %0 {offsets = [0, 0], sizes = [8, 1], strides = [1, 1]} : vector<8x4xi32> to vector<8x1xi32>
    %3 = vector.broadcast %2 : vector<8x1xi32> to vector<8x128xi32>
    %4 = arith.cmpi eq, %1, %3 : vector<8x128xi32>
    %5 = vector.extract_strided_slice %0 {offsets = [0, 1], sizes = [8, 1], strides = [1, 1]} : vector<8x4xi32> to vector<8x1xi32>
    %6 = vector.broadcast %5 : vector<8x1xi32> to vector<8x128xi32>
    %7 = arith.cmpi eq, %1, %6 : vector<8x128xi32>
    %8 = arith.ori %4, %7 : vector<8x128xi1>
    %9 = vector.extract_strided_slice %0 {offsets = [0, 2], sizes = [8, 1], strides = [1, 1]} : vector<8x4xi32> to vector<8x1xi32>
    %10 = vector.broadcast %9 : vector<8x1xi32> to vector<8x128xi32>
    %11 = arith.cmpi eq, %1, %10 : vector<8x128xi32>
    %12 = arith.ori %8, %11 : vector<8x128xi1>
    %13 = vector.extract_strided_slice %0 {offsets = [0, 3], sizes = [8, 1], strides = [1, 1]} : vector<8x4xi32> to vector<8x1xi32>
    %14 = vector.broadcast %13 : vector<8x1xi32> to vector<8x128xi32>
    %15 = arith.cmpi eq, %1, %14 : vector<8x128xi32>
    %16 = arith.ori %12, %15 : vector<8x128xi1>
    %17 = arith.extui %16 : vector<8x128xi1> to vector<8x128xi32>
    %18 = arith.sitofp %17 : vector<8x128xi32> to vector<8x128xf32>
    %c0_1 = arith.constant 0 : index
    %c0_2 = arith.constant 0 : index
    %19 = vector.load %arg2[%c0_1, %c0_2] : memref<128x32xf32, #tpu.memory_space<vmem>>, vector<128x32xf32>
    %cst = arith.constant dense<0.000000e+00> : vector<8x32xf32>
    %20 = tpu.matmul %18, %19, %cst {dimension_numbers = #tpu.dot_dimension_numbers<[1], [0], [0], [1], [0, 0, 1, 1], [], []>} : vector<8x128xf32>, vector<128x32xf32>, vector<8x32xf32> -> vector<8x32xf32>
    %c0_3 = arith.constant 0 : index
    %c0_4 = arith.constant 0 : index
    %21 = vector.load %arg3[%c0_3, %c0_4] : memref<1x32xf32, #tpu.memory_space<vmem>>, vector<1x32xf32>
    %22 = vector.broadcast %21 : vector<1x32xf32> to vector<8x32xf32>
    %23 = arith.addf %20, %22 : vector<8x32xf32>
    %c0_5 = arith.constant 0 : index
    %c0_6 = arith.constant 0 : index
    %24 = vector.load %arg4[%c0_5, %c0_6] : memref<8x32xf32, #tpu.memory_space<vmem>>, vector<8x32xf32>
    tpu.vector_store %arg4[%c0_5, %c0_6], %23 {strides = array<i32>} : memref<8x32xf32, #tpu.memory_space<vmem>>, vector<8x32xf32>,
    return
  }
  func.func @transform_0(%arg0: i32) -> (i32, i32) {
    %c0_i32 = arith.constant 0 : i32
    %c0_i32_0 = arith.constant 0 : i32
    return %arg0, %c0_i32 : i32, i32
  }
  func.func @transform_1(%arg0: i32) -> (i32, i32) {
    %c0_i32 = arith.constant 0 : i32
    %c0_i32_0 = arith.constant 0 : i32
    %c0_i32_1 = arith.constant 0 : i32
    return %c0_i32, %c0_i32_0 : i32, i32
  }
  func.func @transform_2(%arg0: i32) -> (i32, i32) {
    %c0_i32 = arith.constant 0 : i32
    %c0_i32_0 = arith.constant 0 : i32
    %c0_i32_1 = arith.constant 0 : i32
    return %c0_i32, %c0_i32_0 : i32, i32
  }
  func.func @transform_3(%arg0: i32) -> (i32, i32) {
    %c0_i32 = arith.constant 0 : i32
    %c0_i32_0 = arith.constant 0 : i32
    return %arg0, %c0_i32 : i32, i32
  }
}

module attributes {stable_mosaic.version = 11 : i64} {
  func.func @edge_kernel(%arg0: i32, %arg1: memref<16x19xf32, #tpu.memory_space<vmem>>, %arg2: memref<19x32xf32, #tpu.memory_space<vmem>>, %arg3: memref<1x32xf32, #tpu.memory_space<vmem>>, %arg4: memref<16x32xf32, #tpu.memory_space<vmem>>) attributes {dimension_semantics = [#tpu.dimension_semantics<parallel>], iteration_bounds = array<i64: 1>, scalar_prefetch = 0 : i64, scratch_operands = 0 : i64, tpu.core_type = #tpu.core_type<tc>, window_params = [{transform_indices = @transform_0, window_bounds = array<i64: 16, 19>}, {pipeline_mode = #tpu.pipeline_mode<synchronous>, transform_indices = @transform_1, window_bounds = array<i64: 19, 32>}, {pipeline_mode = #tpu.pipeline_mode<synchronous>, transform_indices = @transform_2, window_bounds = array<i64: 1, 32>}, {transform_indices = @transform_3, window_bounds = array<i64: 16, 32>}]} {
    %c0 = arith.constant 0 : index
    %c0_0 = arith.constant 0 : index
    %0 = vector.load %arg1[%c0, %c0_0] : memref<16x19xf32, #tpu.memory_space<vmem>>, vector<16x19xf32>
    %c0_1 = arith.constant 0 : index
    %c0_2 = arith.constant 0 : index
    %1 = vector.load %arg2[%c0_1, %c0_2] : memref<19x32xf32, #tpu.memory_space<vmem>>, vector<19x32xf32>
    %cst = arith.constant dense<0.000000e+00> : vector<16x32xf32>
    %2 = tpu.matmul %0, %1, %cst {dimension_numbers = #tpu.dot_dimension_numbers<[1], [0], [0], [1], [0, 0, 1, 1], [], []>} : vector<16x19xf32>, vector<19x32xf32>, vector<16x32xf32> -> vector<16x32xf32>
    %c0_3 = arith.constant 0 : index
    %c0_4 = arith.constant 0 : index
    %3 = vector.load %arg3[%c0_3, %c0_4] : memref<1x32xf32, #tpu.memory_space<vmem>>, vector<1x32xf32>
    %4 = vector.broadcast %3 : vector<1x32xf32> to vector<16x32xf32>
    %5 = arith.addf %2, %4 : vector<16x32xf32>
    %c0_5 = arith.constant 0 : index
    %c0_6 = arith.constant 0 : index
    %6 = vector.load %arg4[%c0_5, %c0_6] : memref<16x32xf32, #tpu.memory_space<vmem>>, vector<16x32xf32>
    tpu.vector_store %arg4[%c0_5, %c0_6], %5 {strides = array<i32>} : memref<16x32xf32, #tpu.memory_space<vmem>>, vector<16x32xf32>,
    return
  }
  func.func @transform_0(%arg0: i32) -> (i32, i32) {
    %c0_i32 = arith.constant 0 : i32
    %c0_i32_0 = arith.constant 0 : i32
    return %arg0, %c0_i32 : i32, i32
  }
  func.func @transform_1(%arg0: i32) -> (i32, i32) {
    %c0_i32 = arith.constant 0 : i32
    %c0_i32_0 = arith.constant 0 : i32
    %c0_i32_1 = arith.constant 0 : i32
    return %c0_i32, %c0_i32_0 : i32, i32
  }
  func.func @transform_2(%arg0: i32) -> (i32, i32) {
    %c0_i32 = arith.constant 0 : i32
    %c0_i32_0 = arith.constant 0 : i32
    %c0_i32_1 = arith.constant 0 : i32
    return %c0_i32, %c0_i32_0 : i32, i32
  }
  func.func @transform_3(%arg0: i32) -> (i32, i32) {
    %c0_i32 = arith.constant 0 : i32
    %c0_i32_0 = arith.constant 0 : i32
    return %arg0, %c0_i32 : i32, i32
  }
}

</mosaic_0001>

<bundles_post_ra>
// kernel: embedding_block_forward.2
= control target key start
LH: loop header
LB: loop body
LE: loop exit
PB: predicated region body
PF: predicated region fallthrough
CT: control target
= control target key end

     0   :  { %v238_v1 = vmov 0   ;;  %v239_v2 = vmov 2   ;;  %v240_v4 = vmov 0.0   ;;  %v241_v6 = vmov 1   ;;  %s323_s0 = inlined_call_operand.vmem [shape: s32[8,4], index: 0, kind: input, shape index: {}]   ;;  %s324_s1 = inlined_call_operand.vmem [shape: f32[128,32], index: 1, kind: input, shape index: {}]   ;;  %s325_s2 = inlined_call_operand.vmem [shape: f32[1,32], index: 2, kind: input, shape index: {}]   ;;  %s326_s3 = inlined_call_operand.hbm [shape: f32[8,32], index: 3, kind: output, shape index: {}]  }
   0x1   :  { %v15_v0 = vld [vmem:[%s323_s0] sm:$0xff]  ;;  %211 = vset.pattern.permute.xlu0 %v238_v1  ;;  %213 = vset.pattern.permute.xlu1 %v239_v2  ;;  %v54_v3 = vld [vmem:[%s324_s1 + $0x78] sm:$0xff]  ;;  %v53_v5 = vld [vmem:[%s324_s1 + $0x70] sm:$0xff]  ;;  %v242_v7 = vmov 3  }
   0x2   :  { %19 = vperm.xlu0 %211, %v15_v0   ;;  %28 = vperm.xlu1 %213, %v15_v0  }
   0x3   :  { %168 = vmatprep.subr.mxu0 %v240_v4 }
   0x4   :  { %169 = vmatpush3.msra.mxu0 %v54_v3 }
   0x5   :  { %170 = vmatprep.subr.mxu0 %v240_v4 }
   0x6   :  { %212 = vset.pattern.permute.xlu0 %v241_v6  ;;  %214 = vset.pattern.permute.xlu1 %v242_v7 }
   0x7   :  { %8 = vsyncpa [#allocation3], 0  ;;  %23 = vperm.xlu0 %212, %v15_v0   ;;  %33 = vperm.xlu1 %214, %v15_v0   ;;  %v52_v8 = vld [vmem:[%s324_s1 + $0x68] sm:$0xff]  ;;  %vm243_vm0 = vmmov 0   ;;  %v51_v9 = vld [vmem:[%s324_s1 + $0x60] sm:$0xff]  ;;  %v16_v22 = vlaneseq  ;;  %v244_v28 = vmov 1.0  }
   0x8   :  { %171 = vmatpush3.msra.mxu0 %v53_v5  ;;  %200 = vmatprep.mubr.msk.f32.mxu0 %vm243_vm0, %v240_v4  ;;  %v50_v10 = vld [vmem:[%s324_s1 + $0x58] sm:$0xff]  ;;  %v49_v11 = vld [vmem:[%s324_s1 + $0x50] sm:$0xff]  ;;  %v48_v12 = vld [vmem:[%s324_s1 + $0x48] sm:$0xff]  ;;  %s245_s18 = smov [#allocation2]   ;;  %vm132_vm8 = vcmask 261120  }
   0x9   :  { %172 = vmatprep.subr.mxu0 %v240_v4  ;;  %v47_v13 = vld [vmem:[%s324_s1 + $0x40] sm:$0xff]  ;;  %v46_v14 = vld [vmem:[%s324_s1 + $0x38] sm:$0xff]  ;;  %v45_v15 = vld [vmem:[%s324_s1 + $0x30] sm:$0xff]  ;;  %v17_v25 = vand.u32 127, %v16_v22  ;;  %s140_s19 = sshll.u32 %s245_s18, 4  ;;  %s141_s19 = int_to_ptr.vmem [resolvable:$true] %s140_s19 }
   0xa   :  { %173 = vmatpush3.msra.mxu0 %v52_v8  ;;  %v44_v16 = vld [vmem:[%s324_s1 + $0x28] sm:$0xff]  ;;  %v43_v17 = vld [vmem:[%s324_s1 + $0x20] sm:$0xff]  ;;  %v42_v18 = vld [vmem:[%s324_s1 + $0x18] sm:$0xff]  ;;  %s216_s20 = scalar_lea.vmem %s141_s19, 128  ;;  %p221_p1 = scmp.lt.s32.totalorder %s141_s19, %s141_s19 }
   0xb   :  { %174 = vmatprep.subr.mxu0 %v240_v4  ;;  %215 = vset.pattern.permute.xlu0 %v242_v7  ;;  %v41_v19 = vld [vmem:[%s324_s1 + $0x10] sm:$0xff]  ;;  %v40_v20 = vld [vmem:[%s324_s1 + $0x8] sm:$0xff]  ;;  %v39_v21 = vld [vmem:[%s324_s1] sm:$0xff]  ;;  %p217_p0 = scmp.ne.s32.totalorder %s141_s19, %s216_s20  ;;  %p222_p2 = scmp.lt.s32.totalorder %s216_s20, %s216_s20 }
   0xc   :  { %175 = vmatpush3.msra.mxu0 %v51_v9  ;;  %v149_v29 = vld [vmem:[%s325_s2] ss:$0 sm:$0xff] }
   0xd   :  { %176 = vmatprep.subr.mxu0 %v240_v4  ;;  %p223_p3 = por %p222_p2, %p221_p1 }
   0xe   :  { %177 = vmatpush3.msra.mxu0 %v50_v10 }
   0xf   :  { %178 = vmatprep.subr.mxu0 %v240_v4  ;;  %p224_p4 = pnand %p223_p3, %p217_p0 }
  0x10   :  { %179 = vmatpush3.msra.mxu0 %v49_v11 }
  0x11   :  { %180 = vmatprep.subr.mxu0 %v240_v4 }
  0x12   :  { %181 = vmatpush3.msra.mxu0 %v48_v12 }
  0x13   :  { %182 = vmatprep.subr.mxu0 %v240_v4 }
  0x14   :  { %183 = vmatpush3.msra.mxu0 %v47_v13 }
  0x15   :  { %184 = vmatprep.subr.mxu0 %v240_v4 }
  0x16   :  { %185 = vmatpush3.msra.mxu0 %v46_v14 }
  0x17   :  { %186 = vmatprep.subr.mxu0 %v240_v4 }
  0x18   :  { %187 = vmatpush3.msra.mxu0 %v45_v15 }
  0x19   :  { %188 = vmatprep.subr.mxu0 %v240_v4 }
  0x1a   :  { %189 = vmatpush3.msra.mxu0 %v44_v16 }
  0x1b   :  { %190 = vmatprep.subr.mxu0 %v240_v4 }
  0x1c   :  { %191 = vmatpush3.msra.mxu0 %v43_v17 }
  0x1d   :  { %192 = vmatprep.subr.mxu0 %v240_v4 }
  0x1e   :  { %193 = vmatpush3.msra.mxu0 %v42_v18 }
  0x1f   :  { %194 = vmatprep.subr.mxu0 %v240_v4 }
  0x20   :  { %195 = vmatpush3.msra.mxu0 %v41_v19 }
  0x21   :  { %196 = vmatprep.subr.mxu0 %v240_v4 }
  0x22   :  { %197 = vmatpush3.msra.mxu0 %v40_v20 }
  0x23   :  { %198 = vmatprep.subr.mxu0 %v240_v4 }
  0x24   :  { %199 = vmatpush3.msra.mxu0 %v39_v21 }
  0x7d   :  { %v20_v23 = vpop.permute.xlu0 %19  ;;  %v29_v24 = vpop.permute.xlu1 %28 }
  0x7e   :  { %vm21_vm1 = vcmp.eq.s32.totalorder %v17_v25, %v20_v23  ;;  %vm30_vm4 = vcmp.eq.s32.totalorder %v17_v25, %v29_v24 }
  0x82   :  { %v24_v26 = vpop.permute.xlu0 %23  ;;  %v34_v27 = vpop.permute.xlu1 %33 }
  0x83   :  { %vm25_vm2 = vcmp.eq.s32.totalorder %v17_v25, %v24_v26  ;;  %vm35_vm3 = vcmp.eq.s32.totalorder %v17_v25, %v34_v27 }
  0x84   :  { %vm26_vm5 = vmor %vm21_vm1, %vm25_vm2 }
  0x85   :  { %vm31_vm6 = vmor %vm26_vm5, %vm30_vm4 }
  0x86   :  { %vm36_vm7 = vmor %vm31_vm6, %vm35_vm3 }
  0x87   :  { %201 = vmatmul.mubr.msk.f32.vlgmr.msra.gmra.mxu0 %vm36_vm7, %v244_v28 }
 0x147   :  { %v128_v30 = vpop.f32.mrf.mxu0 }
 0x148   :  { %v129_v31 = vadd.f32 %v149_v29, %v128_v30 }
 0x149   :  { %v202_v32 = vpop.f32.mrf.mxu0 }
 0x14a   :  { %133 = vst.msk [vmem:[#allocation2] sm:$0xff] %vm132_vm8, %v129_v31 }
 0x14b   :  { %227 = shalt.err (!%p224_p4)
}
 0x14c   :  { %143 = dma.vmem_to_hbm [thread:$0]  %s141_s19, 128, %s326_s3, [#allocation3]  }
 0x14d   :  { %236 = dma.done.wait [#allocation3], 128  }
 0x14e   :  { %237 = vsyncadd [#allocation3], 4294967168 }
 0x14f   :  { %147 = vsyncpa [#allocation3], 1 }

// kernel: embedding_block_forward.3
= control target key start
LH: loop header
LB: loop body
LE: loop exit
PB: predicated region body
PF: predicated region fallthrough
CT: control target
= control target key end

     0   :  { %vm34_vm0 = vcmask 1042432   ;;  %vm27_vm1 = vcmask 154624   ;;  %s219_s0 = inlined_call_operand.vmem [shape: f32[16,19], index: 0, kind: input, shape index: {}]   ;;  %s220_s1 = inlined_call_operand.vmem [shape: f32[19,32], index: 1, kind: input, shape index: {}]   ;;  %s221_s2 = inlined_call_operand.vmem [shape: f32[1,32], index: 2, kind: input, shape index: {}]   ;;  %s222_s3 = inlined_call_operand.hbm [shape: f32[16,32], index: 3, kind: output, shape index: {}]  }
   0x1   :  { %v19_v0 = vld [vmem:[%s220_s1 + $0x10] sm:$0x7]  ;;  %v18_v1 = vld [vmem:[%s220_s1 + $0x8] sm:$0xff]  ;;  %v15_v2 = vld [vmem:[%s219_s0] sm:$0xff] }
   0x2   :  { %141 = vmatprep.subr.msk.mxu0 %vm34_vm0, %v19_v0 }
   0x3   :  { %8 = vsyncpa [#allocation3], 0  ;;  %142 = vmatpush3.msk.msra.mxu0 %vm34_vm0, %v19_v0  ;;  %v17_v3 = vld [vmem:[%s220_s1] sm:$0xff]  ;;  %147 = vmatprep.mubr.msk.f32.mxu0 %vm27_vm1, %v15_v2  ;;  %v16_v4 = vld [vmem:[%s219_s0 + $0x8] sm:$0xff]  ;;  %s175_s24 = smov [#allocation2]   ;;  %vm113_vm2 = vcmask 261120  }
   0x4   :  { %143 = vmatprep.subr.mxu0 %v18_v1  ;;  %v132_v5 = vld [vmem:[%s221_s2] ss:$0 sm:$0xff]  ;;  %s121_s25 = sshll.u32 %s175_s24, 4  ;;  %s122_s25 = int_to_ptr.vmem [resolvable:$true] %s121_s25 }
   0x5   :  { %144 = vmatpush3.msra.mxu0 %v18_v1  ;;  %s153_s1 = scalar_lea.vmem %s122_s25, 256  ;;  %p158_p1 = scmp.lt.s32.totalorder %s122_s25, %s122_s25 }
   0x6   :  { %145 = vmatprep.subr.mxu0 %v17_v3  ;;  %p154_p0 = scmp.ne.s32.totalorder %s122_s25, %s153_s1  ;;  %p159_p2 = scmp.lt.s32.totalorder %s153_s1, %s153_s1 }
   0x7   :  { %146 = vmatpush3.msra.mxu0 %v17_v3 }
   0x8   :  { %148 = vmatmul.mubr.msk.f32.vlgmr.msra.gmra.mxu0 %vm27_vm1, %v16_v4  ;;  %p160_p3 = por %p159_p2, %p158_p1 }
   0xa   :  { %p161_p4 = pnand %p160_p3, %p154_p0 }
  0xc8   :  { %v149_v6 = vpop.f32.mrf.mxu0 }
  0xc9   :  { %v110_v7 = vadd.f32 %v149_v6, %v132_v5 }
  0xca   :  { %v104_v8 = vpop.f32.mrf.mxu0 }
  0xcb   :  { %115 = vst.msk [vmem:[#allocation2 + $0x8] sm:$0xff] %vm113_vm2, %v110_v7  ;;  %v105_v9 = vadd.f32 %v132_v5, %v104_v8 }
  0xcd   :  { %114 = vst.msk [vmem:[#allocation2] sm:$0xff] %vm113_vm2, %v105_v9 }
  0xce   :  { %164 = shalt.err (!%p161_p4)
}
  0xcf   :  { %s176_s0 = smov 128   ;;  %s177_s26 = smov 8  }
  0xd0   :  { %127 = dma.vmem_to_hbm [thread:$0]  %s122_s25, 256, %s222_s3, [#allocation3], %s176_s0, %s176_s0, %s177_s26  }
  0xd1   :  { %173 = dma.done.wait [#allocation3], 256  }
  0xd2   :  { %174 = vsyncadd [#allocation3], 4294967040 }
  0xd3   :  { %131 = vsyncpa [#allocation3], 1 }

</bundles_post_ra>
